<compile_context>
chip_gen: v7x
topology: tpu7x:2x2x1
jax: 0.10.0
libtpu: 0.0.40
codegen_flags: <defaults>
</compile_context>

<pallas_src>
import functools
import math

import jax
import jax.numpy as jnp
from jax.experimental import pallas as pl
from jax.experimental.pallas import tpu as pltpu


# ----------------------------- Pallas kernel ------------------------------ #
def _bert_embed_kernel(S, TS, NUM_SEM, TYPE_VOCAB,
                       ids_ref,        # SMEM scalar prefetch: (B*S,) int32
                       segs_ref,       # VMEM: (TS, 1) int32 segment ids
                       tok_hbm,        # HBM (pl.ANY): (vocab, E) f32
                       pos_ref,        # VMEM: (TS, E) f32 positional rows
                       segtab_ref,     # VMEM: (TYPE_VOCAB, E) f32
                       o_ref,          # VMEM out: (TS, E) f32
                       tok_buf,        # VMEM scratch: (TS, E) f32
                       sems):          # DMA semaphores: (NUM_SEM,)
    b = pl.program_id(0)
    st = pl.program_id(1)
    base = b * S + st * TS            # flat index of first token in this tile

    def start_row(r):
        tok_id = ids_ref[base + r]
        pltpu.make_async_copy(
            tok_hbm.at[pl.ds(tok_id, 1), :],
            tok_buf.at[pl.ds(r, 1), :],
            sems.at[r % NUM_SEM],
        ).start()

    def wait_row(r):
        # Same-shape descriptor; wait only needs the byte count + semaphore.
        pltpu.make_async_copy(
            tok_hbm.at[pl.ds(0, 1), :],
            tok_buf.at[pl.ds(r, 1), :],
            sems.at[r % NUM_SEM],
        ).wait()

    # Prologue: NUM_SEM outstanding row-gather DMAs.
    @pl.loop(0, NUM_SEM)
    def _(r):
        start_row(r)

    # Steady state: wait row r, immediately refill that semaphore slot.
    @pl.loop(0, TS)
    def _(r):
        wait_row(r)

        @pl.when(r + NUM_SEM < TS)
        def _():
            start_row(r + NUM_SEM)

    tok = tok_buf[...]                # (TS, E)
    pos = pos_ref[...]                # (TS, E)
    segs = segs_ref[...]              # (TS, 1) int32
    seg_tab = segtab_ref[...]         # (TYPE_VOCAB, E)

    # Segment embedding via VPU select against the tiny resident table.
    seg_emb = jnp.zeros_like(tok)
    for c in range(TYPE_VOCAB):       # TYPE_VOCAB is a small Python int
        seg_emb = seg_emb + jnp.where(segs == c, 1.0, 0.0) * seg_tab[c][None, :]

    o_ref[...] = tok + pos + seg_emb


# ------------------------------- wrapper ----------------------------------- #
def bert_embedding_forward(input_ids, token_type_ids, token_table, pos_table,
                           seg_table, *, tile_tokens=512, num_outstanding=8):
    """Pallas implementation of BERTEmbedding.forward (eval mode).

    input_ids:       (B, S) int32
    token_type_ids:  (B, S) int32 or None
    token_table:     (vocab_size, E) float32
    pos_table:       (max_len, E)   float32  (precomputed sinusoidal table)
    seg_table:       (type_vocab_size, E) float32
    returns:         (B, S, E) float32
    """
    B, S = input_ids.shape
    vocab, E = token_table.shape
    TV = seg_table.shape[0]

    if token_type_ids is None:
        token_type_ids = jnp.zeros_like(input_ids)

    # Tile size along the sequence: a tile never crosses a sequence boundary,
    # so the positional rows for a tile are a contiguous pos_table slice.
    if S <= tile_tokens:
        TS = S
    else:
        TS = S
        for cand in range(min(tile_tokens, S), 7, -1):
            if S % cand == 0 and cand % 8 == 0:
                TS = cand
                break
    NUM_SEM = max(1, min(num_outstanding, TS))

    # Clamp ids so a garbage id can never drive an out-of-bounds gather DMA.
    ids_flat = jnp.clip(input_ids.reshape(-1), 0, vocab - 1).astype(jnp.int32)
    segs3 = jnp.clip(token_type_ids, 0, TV - 1).astype(jnp.int32).reshape(B, S, 1)
    pos_sl = pos_table[:S].astype(jnp.float32)        # (S, E)
    tok_tab = token_table.astype(jnp.float32)         # stays in HBM
    seg_tab = seg_table.astype(jnp.float32)

    n_tok = B * S
    grid = (B, S // TS)

    kernel = functools.partial(_bert_embed_kernel, S, TS, NUM_SEM, TV)

    cost = pl.CostEstimate(
        flops=2 * n_tok * E,
        transcendentals=0,
        bytes_accessed=(n_tok * E * 4      # gathered token rows
                        + S * E * 4        # positional table
                        + TV * E * 4       # segment table
                        + n_tok * 4        # segment ids
                        + n_tok * E * 4))  # output

    out = pl.pallas_call(
        kernel,
        out_shape=jax.ShapeDtypeStruct((B, S, E), jnp.float32),
        grid_spec=pltpu.PrefetchScalarGridSpec(
            num_scalar_prefetch=1,
            grid=grid,
            in_specs=[
                # segment ids for this tile: (TS, 1)
                pl.BlockSpec((None, TS, 1), lambda b, st, ids: (b, st, 0)),
                # token table: raw HBM ref, manual gather DMA in-kernel
                pl.BlockSpec(memory_space=pl.ANY),
                # positional rows for this sequence tile: (TS, E)
                pl.BlockSpec((TS, E), lambda b, st, ids: (st, 0)),
                # full segment table, constant block -> VMEM-resident
                pl.BlockSpec((TV, E), lambda b, st, ids: (0, 0)),
            ],
            out_specs=pl.BlockSpec((None, TS, E), lambda b, st, ids: (b, st, 0)),
            scratch_shapes=[
                pltpu.VMEM((TS, E), jnp.float32),       # gathered token rows
                pltpu.SemaphoreType.DMA((NUM_SEM,)),    # gather DMA ring
            ],
        ),
        compiler_params=pltpu.CompilerParams(
            dimension_semantics=("parallel", "parallel")),
        cost_estimate=cost,
    )(ids_flat, segs3, tok_tab, pos_sl, seg_tab)

    # TODO(synk): torch.nn.Dropout(p=0.1) training-mode RNG is not reproduced;
    # eval-mode dropout is identity, which is what we apply.
    return out


# --------------------------- parameter builders ---------------------------- #
def make_positional_table(d_model, max_len):
    """Exact reproduction of PositionalEmbedding.__init__ buffer `pe`."""
    pos = jnp.arange(max_len, dtype=jnp.float32)[:, None]            # (L, 1)
    i_even = jnp.arange(0, d_model, 2, dtype=jnp.float32)            # (E/2,)
    div_sin = jnp.power(10000.0, 2.0 * i_even / d_model)
    div_cos = jnp.power(10000.0, 2.0 * (i_even + 1.0) / d_model)
    pe_sin = jnp.sin(pos / div_sin)                                  # (L, E/2)
    pe_cos = jnp.cos(pos / div_cos)                                  # (L, E/2)
    pe = jnp.stack([pe_sin, pe_cos], axis=-1).reshape(max_len, d_model)
    return pe.astype(jnp.float32)


def make_params(key, vocab_size, embed_size, seq_len, type_vocab_size, pad_id):
    k_tok, k_seg = jax.random.split(key)
    token_table = jax.random.normal(k_tok, (vocab_size, embed_size),
                                    dtype=jnp.float32)
    token_table = token_table.at[pad_id].set(0.0)  # padding_idx row = 0
    seg_table = jax.random.normal(k_seg, (type_vocab_size, embed_size),
                                  dtype=jnp.float32)
    pos_table = make_positional_table(embed_size, seq_len)
    return token_table, pos_table, seg_table


# ---------------------------------- main ----------------------------------- #
if __name__ == "__main__":
    # Small but module-consistent shapes (PAD_ID=7322 forces vocab > 7324).
    # E=128 keeps the output tile lane-dense (multiple of 128 lanes).
    B, S = 2, 16
    embed_size = 128
    seq_len = 16
    vocab_size = 7328
    type_vocab_size = 3
    PAD_ID = 7322

    key = jax.random.PRNGKey(0)
    k_param, k_ids, k_segs = jax.random.split(key, 3)

    token_table, pos_table, seg_table = make_params(
        k_param, vocab_size, embed_size, seq_len, type_vocab_size, PAD_ID)

    input_ids = jax.random.randint(k_ids, (B, S), 0, vocab_size,
                                   dtype=jnp.int32)
    token_type_ids = jax.random.randint(k_segs, (B, S), 0, type_vocab_size,
                                        dtype=jnp.int32)

    out = bert_embedding_forward(input_ids, token_type_ids,
                                 token_table, pos_table, seg_table)
    out = jax.block_until_ready(out)

    # Pure-JAX reference for a correctness sanity check.
    ref = (token_table[input_ids]
           + pos_table[:S][None, :, :]
           + seg_table[token_type_ids])
    assert out.shape == (B, S, embed_size)
    assert jnp.allclose(out, ref, atol=1e-5, rtol=1e-5)

    print("KERNEL_OK")
</pallas_src>

<mosaic_0001>
module attributes {stable_mosaic.version = 11 : i64} {
  func.func @_bert_embed_kernel(%arg0: i32, %arg1: i32, %arg2: memref<32xi32, #tpu.memory_space<smem>>, %arg3: memref<1x16x1xi32, #tpu.memory_space<vmem>>, %arg4: memref<7328x128xf32, #tpu.memory_space<any>>, %arg5: memref<16x128xf32, #tpu.memory_space<vmem>>, %arg6: memref<3x128xf32, #tpu.memory_space<vmem>>, %arg7: memref<1x16x128xf32, #tpu.memory_space<vmem>>, %arg8: memref<16x128xf32, #tpu.memory_space<vmem>>, %arg9: memref<8x!tpu.dma_semaphore, #tpu.memory_space<semaphore_mem>>) attributes {dimension_semantics = [#tpu.dimension_semantics<parallel>, #tpu.dimension_semantics<parallel>], iteration_bounds = array<i64: 2, 1>, scalar_prefetch = 1 : i64, scratch_operands = 2 : i64, tpu.core_type = #tpu.core_type<tc>, window_params = [{transform_indices = @transform_0, window_bounds = array<i64: 1, 16, 1>}, {}, {transform_indices = @transform_2, window_bounds = array<i64: 16, 128>}, {pipeline_mode = #tpu.pipeline_mode<synchronous>, transform_indices = @transform_3, window_bounds = array<i64: 3, 128>}, {transform_indices = @transform_4, window_bounds = array<i64: 1, 16, 128>}]} {
    %c16_i32 = arith.constant 16 : i32
    %0 = arith.muli %arg0, %c16_i32 : i32
    %c16_i32_0 = arith.constant 16 : i32
    %1 = arith.muli %arg1, %c16_i32_0 : i32
    %2 = arith.addi %0, %1 : i32
    %c0_i32 = arith.constant 0 : i32
    %c8_i32 = arith.constant 8 : i32
    %3 = arith.addi %c0_i32, %c8_i32 : i32
    %c1_i32 = arith.constant 1 : i32
    scf.for %arg10 = %c0_i32 to %3 step %c1_i32  : i32 {
      %c1_i32_25 = arith.constant 1 : i32
      %52 = arith.muli %arg10, %c1_i32_25 : i32
      %c0_i32_26 = arith.constant 0 : i32
      %53 = arith.addi %c0_i32_26, %52 : i32
      %54 = arith.addi %2, %53 : i32
      %55 = arith.index_cast %54 : i32 to index
      %56 = memref.load %arg2[%55] : memref<32xi32, #tpu.memory_space<smem>>
      %c8_i32_27 = arith.constant 8 : i32
      %c0_i32_28 = arith.constant 0 : i32
      %57 = arith.cmpi eq, %c8_i32_27, %c0_i32_28 : i32
      %c1_i32_29 = arith.constant 1 : i32
      %58 = arith.select %57, %c1_i32_29, %c8_i32_27 : i32
      %59 = arith.remsi %53, %58 : i32
      %c0_i32_30 = arith.constant 0 : i32
      %60 = arith.cmpi ne, %59, %c0_i32_30 : i32
      %c0_i32_31 = arith.constant 0 : i32
      %61 = arith.cmpi slt, %59, %c0_i32_31 : i32
      %c0_i32_32 = arith.constant 0 : i32
      %62 = arith.cmpi slt, %58, %c0_i32_32 : i32
      %63 = arith.xori %61, %62 : i1
      %64 = arith.andi %63, %60 : i1
      %65 = arith.addi %59, %58 : i32
      %66 = arith.select %64, %65, %59 : i32
      %c0_i32_33 = arith.constant 0 : i32
      %67 = tpu.memref_slice %arg4[%56, %c0_i32_33] : memref<7328x128xf32, #tpu.memory_space<any>> -> memref<1x128xf32, #tpu.memory_space<any>>
      %c0_i32_34 = arith.constant 0 : i32
      %68 = tpu.memref_slice %arg8[%53, %c0_i32_34] : memref<16x128xf32, #tpu.memory_space<vmem>> -> memref<1x128xf32, #tpu.memory_space<vmem>>
      %69 = tpu.memref_slice %arg9[%66] : memref<8x!tpu.dma_semaphore, #tpu.memory_space<semaphore_mem>> -> memref<1x!tpu.dma_semaphore, #tpu.memory_space<semaphore_mem>>
      %70 = tpu.memref_squeeze %69 : memref<1x!tpu.dma_semaphore, #tpu.memory_space<semaphore_mem>> -> memref<!tpu.dma_semaphore, #tpu.memory_space<semaphore_mem>>
      tpu.enqueue_dma source(%67 : memref<1x128xf32, #tpu.memory_space<any>>) target(%68 : memref<1x128xf32, #tpu.memory_space<vmem>>) target_semaphore(%70 : memref<!tpu.dma_semaphore, #tpu.memory_space<semaphore_mem>>)
    }
    %c8_i32_1 = arith.constant 8 : i32
    %c0_i32_2 = arith.constant 0 : i32
    %c16_i32_3 = arith.constant 16 : i32
    %4 = arith.addi %c0_i32_2, %c16_i32_3 : i32
    %c1_i32_4 = arith.constant 1 : i32
    scf.for %arg10 = %c0_i32_2 to %4 step %c1_i32_4  : i32 {
      %c1_i32_25 = arith.constant 1 : i32
      %52 = arith.muli %arg10, %c1_i32_25 : i32
      %c0_i32_26 = arith.constant 0 : i32
      %53 = arith.addi %c0_i32_26, %52 : i32
      %c8_i32_27 = arith.constant 8 : i32
      %c0_i32_28 = arith.constant 0 : i32
      %54 = arith.cmpi eq, %c8_i32_27, %c0_i32_28 : i32
      %c1_i32_29 = arith.constant 1 : i32
      %55 = arith.select %54, %c1_i32_29, %c8_i32_27 : i32
      %56 = arith.remsi %53, %55 : i32
      %c0_i32_30 = arith.constant 0 : i32
      %57 = arith.cmpi ne, %56, %c0_i32_30 : i32
      %c0_i32_31 = arith.constant 0 : i32
      %58 = arith.cmpi slt, %56, %c0_i32_31 : i32
      %c0_i32_32 = arith.constant 0 : i32
      %59 = arith.cmpi slt, %55, %c0_i32_32 : i32
      %60 = arith.xori %58, %59 : i1
      %61 = arith.andi %60, %57 : i1
      %62 = arith.addi %56, %55 : i32
      %63 = arith.select %61, %62, %56 : i32
      %c0_i32_33 = arith.constant 0 : i32
      %c0_i32_34 = arith.constant 0 : i32
      %64 = tpu.memref_slice %arg4[%c0_i32_33, %c0_i32_34] : memref<7328x128xf32, #tpu.memory_space<any>> -> memref<1x128xf32, #tpu.memory_space<any>>
      %c0_i32_35 = arith.constant 0 : i32
      %65 = tpu.memref_slice %arg8[%53, %c0_i32_35] : memref<16x128xf32, #tpu.memory_space<vmem>> -> memref<1x128xf32, #tpu.memory_space<vmem>>
      %66 = tpu.memref_slice %arg9[%63] : memref<8x!tpu.dma_semaphore, #tpu.memory_space<semaphore_mem>> -> memref<1x!tpu.dma_semaphore, #tpu.memory_space<semaphore_mem>>
      %67 = tpu.memref_squeeze %66 : memref<1x!tpu.dma_semaphore, #tpu.memory_space<semaphore_mem>> -> memref<!tpu.dma_semaphore, #tpu.memory_space<semaphore_mem>>
      tpu.wait_dma2 semaphore(%67 : memref<!tpu.dma_semaphore, #tpu.memory_space<semaphore_mem>>) src(%64 : memref<1x128xf32, #tpu.memory_space<any>>) dst(%65 : memref<1x128xf32, #tpu.memory_space<vmem>>)
      %c8_i32_36 = arith.constant 8 : i32
      %68 = arith.addi %53, %c8_i32_36 : i32
      %c16_i32_37 = arith.constant 16 : i32
      %69 = arith.cmpi slt, %68, %c16_i32_37 : i32
      %70 = arith.extui %69 : i1 to i32
      %c0_i32_38 = arith.constant 0 : i32
      %71 = arith.cmpi ne, %70, %c0_i32_38 : i32
      scf.if %71 {
        %c8_i32_39 = arith.constant 8 : i32
        %72 = arith.addi %53, %c8_i32_39 : i32
        %73 = arith.addi %2, %72 : i32
        %74 = arith.index_cast %73 : i32 to index
        %75 = memref.load %arg2[%74] : memref<32xi32, #tpu.memory_space<smem>>
        %c8_i32_40 = arith.constant 8 : i32
        %c0_i32_41 = arith.constant 0 : i32
        %76 = arith.cmpi eq, %c8_i32_40, %c0_i32_41 : i32
        %c1_i32_42 = arith.constant 1 : i32
        %77 = arith.select %76, %c1_i32_42, %c8_i32_40 : i32
        %78 = arith.remsi %72, %77 : i32
        %c0_i32_43 = arith.constant 0 : i32
        %79 = arith.cmpi ne, %78, %c0_i32_43 : i32
        %c0_i32_44 = arith.constant 0 : i32
        %80 = arith.cmpi slt, %78, %c0_i32_44 : i32
        %c0_i32_45 = arith.constant 0 : i32
        %81 = arith.cmpi slt, %77, %c0_i32_45 : i32
        %82 = arith.xori %80, %81 : i1
        %83 = arith.andi %82, %79 : i1
        %84 = arith.addi %78, %77 : i32
        %85 = arith.select %83, %84, %78 : i32
        %c0_i32_46 = arith.constant 0 : i32
        %86 = tpu.memref_slice %arg4[%75, %c0_i32_46] : memref<7328x128xf32, #tpu.memory_space<any>> -> memref<1x128xf32, #tpu.memory_space<any>>
        %c0_i32_47 = arith.constant 0 : i32
        %87 = tpu.memref_slice %arg8[%72, %c0_i32_47] : memref<16x128xf32, #tpu.memory_space<vmem>> -> memref<1x128xf32, #tpu.memory_space<vmem>>
        %88 = tpu.memref_slice %arg9[%85] : memref<8x!tpu.dma_semaphore, #tpu.memory_space<semaphore_mem>> -> memref<1x!tpu.dma_semaphore, #tpu.memory_space<semaphore_mem>>
        %89 = tpu.memref_squeeze %88 : memref<1x!tpu.dma_semaphore, #tpu.memory_space<semaphore_mem>> -> memref<!tpu.dma_semaphore, #tpu.memory_space<semaphore_mem>>
        tpu.enqueue_dma source(%86 : memref<1x128xf32, #tpu.memory_space<any>>) target(%87 : memref<1x128xf32, #tpu.memory_space<vmem>>) target_semaphore(%89 : memref<!tpu.dma_semaphore, #tpu.memory_space<semaphore_mem>>)
      } else {
      }
    }
    %c16_i32_5 = arith.constant 16 : i32
    %c0 = arith.constant 0 : index
    %c0_6 = arith.constant 0 : index
    %5 = vector.load %arg8[%c0, %c0_6] : memref<16x128xf32, #tpu.memory_space<vmem>>, vector<16x128xf32>
    %c0_7 = arith.constant 0 : index
    %c0_8 = arith.constant 0 : index
    %6 = vector.load %arg5[%c0_7, %c0_8] : memref<16x128xf32, #tpu.memory_space<vmem>>, vector<16x128xf32>
    %c0_9 = arith.constant 0 : index
    %c0_10 = arith.constant 0 : index
    %c0_11 = arith.constant 0 : index
    %7 = vector.load %arg3[%c0_9, %c0_10, %c0_11] : memref<1x16x1xi32, #tpu.memory_space<vmem>>, vector<1x16x1xi32>
    %8 = vector.shape_cast %7 : vector<1x16x1xi32> to vector<16x1xi32>
    %c0_12 = arith.constant 0 : index
    %c0_13 = arith.constant 0 : index
    %9 = vector.load %arg6[%c0_12, %c0_13] : memref<3x128xf32, #tpu.memory_space<vmem>>, vector<3x128xf32>
    %cst = arith.constant 0.000000e+00 : f32
    %10 = vector.broadcast %cst : f32 to vector<16x128xf32>
    %c0_i32_14 = arith.constant 0 : i32
    %11 = vector.broadcast %c0_i32_14 : i32 to vector<16x1xi32>
    %12 = arith.cmpi eq, %8, %11 : vector<16x1xi32>
    %cst_15 = arith.constant 1.000000e+00 : f32
    %cst_16 = arith.constant 0.000000e+00 : f32
    %13 = vector.broadcast %cst_15 : f32 to vector<16x1xf32>
    %14 = vector.broadcast %cst_16 : f32 to vector<16x1xf32>
    %15 = arith.select %12, %13, %14 : vector<16x1xi1>, vector<16x1xf32>
    %16 = vector.extract_strided_slice %9 {offsets = [0, 0], sizes = [1, 128], strides = [1, 1]} : vector<3x128xf32> to vector<1x128xf32>
    %17 = vector.shape_cast %16 : vector<1x128xf32> to vector<128xf32>
    %18 = vector.shape_cast %17 : vector<128xf32> to vector<1x128xf32>
    %19 = vector.broadcast %15 : vector<16x1xf32> to vector<16x128xf32>
    %20 = vector.broadcast %18 : vector<1x128xf32> to vector<16x128xf32>
    %21 = arith.mulf %19, %20 : vector<16x128xf32>
    %22 = arith.addf %10, %21 : vector<16x128xf32>
    %c1_i32_17 = arith.constant 1 : i32
    %23 = vector.broadcast %c1_i32_17 : i32 to vector<16x1xi32>
    %24 = arith.cmpi eq, %8, %23 : vector<16x1xi32>
    %cst_18 = arith.constant 1.000000e+00 : f32
    %cst_19 = arith.constant 0.000000e+00 : f32
    %25 = vector.broadcast %cst_18 : f32 to vector<16x1xf32>
    %26 = vector.broadcast %cst_19 : f32 to vector<16x1xf32>
    %27 = arith.select %24, %25, %26 : vector<16x1xi1>, vector<16x1xf32>
    %28 = vector.extract_strided_slice %9 {offsets = [1, 0], sizes = [1, 128], strides = [1, 1]} : vector<3x128xf32> to vector<1x128xf32>
    %29 = vector.shape_cast %28 : vector<1x128xf32> to vector<128xf32>
    %30 = vector.shape_cast %29 : vector<128xf32> to vector<1x128xf32>
    %31 = vector.broadcast %27 : vector<16x1xf32> to vector<16x128xf32>
    %32 = vector.broadcast %30 : vector<1x128xf32> to vector<16x128xf32>
    %33 = arith.mulf %31, %32 : vector<16x128xf32>
    %34 = arith.addf %22, %33 : vector<16x128xf32>
    %c2_i32 = arith.constant 2 : i32
    %35 = vector.broadcast %c2_i32 : i32 to vector<16x1xi32>
    %36 = arith.cmpi eq, %8, %35 : vector<16x1xi32>
    %cst_20 = arith.constant 1.000000e+00 : f32
    %cst_21 = arith.constant 0.000000e+00 : f32
    %37 = vector.broadcast %cst_20 : f32 to vector<16x1xf32>
    %38 = vector.broadcast %cst_21 : f32 to vector<16x1xf32>
    %39 = arith.select %36, %37, %38 : vector<16x1xi1>, vector<16x1xf32>
    %40 = vector.extract_strided_slice %9 {offsets = [2, 0], sizes = [1, 128], strides = [1, 1]} : vector<3x128xf32> to vector<1x128xf32>
    %41 = vector.shape_cast %40 : vector<1x128xf32> to vector<128xf32>
    %42 = vector.shape_cast %41 : vector<128xf32> to vector<1x128xf32>
    %43 = vector.broadcast %39 : vector<16x1xf32> to vector<16x128xf32>
    %44 = vector.broadcast %42 : vector<1x128xf32> to vector<16x128xf32>
    %45 = arith.mulf %43, %44 : vector<16x128xf32>
    %46 = arith.addf %34, %45 : vector<16x128xf32>
    %47 = arith.addf %5, %6 : vector<16x128xf32>
    %48 = arith.addf %47, %46 : vector<16x128xf32>
    %c0_22 = arith.constant 0 : index
    %c0_23 = arith.constant 0 : index
    %c0_24 = arith.constant 0 : index
    %49 = vector.load %arg7[%c0_22, %c0_23, %c0_24] : memref<1x16x128xf32, #tpu.memory_space<vmem>>, vector<1x16x128xf32>
    %50 = vector.shape_cast %49 : vector<1x16x128xf32> to vector<16x128xf32>
    %51 = vector.shape_cast %48 : vector<16x128xf32> to vector<1x16x128xf32>
    tpu.vector_store %arg7[%c0_22, %c0_23, %c0_24], %51 {strides = array<i32>} : memref<1x16x128xf32, #tpu.memory_space<vmem>>, vector<1x16x128xf32>,
    return
  }
  func.func @transform_0(%arg0: i32, %arg1: i32, %arg2: memref<32xi32, #tpu.memory_space<smem>>) -> (i32, i32, i32) {
    %c0_i32 = arith.constant 0 : i32
    %c0_i32_0 = arith.constant 0 : i32
    return %arg0, %arg1, %c0_i32 : i32, i32, i32
  }
  func.func @transform_2(%arg0: i32, %arg1: i32, %arg2: memref<32xi32, #tpu.memory_space<smem>>) -> (i32, i32) {
    %c0_i32 = arith.constant 0 : i32
    %c0_i32_0 = arith.constant 0 : i32
    return %arg1, %c0_i32 : i32, i32
  }
  func.func @transform_3(%arg0: i32, %arg1: i32, %arg2: memref<32xi32, #tpu.memory_space<smem>>) -> (i32, i32) {
    %c0_i32 = arith.constant 0 : i32
    %c0_i32_0 = arith.constant 0 : i32
    %c0_i32_1 = arith.constant 0 : i32
    return %c0_i32, %c0_i32_0 : i32, i32
  }
  func.func @transform_4(%arg0: i32, %arg1: i32, %arg2: memref<32xi32, #tpu.memory_space<smem>>) -> (i32, i32, i32) {
    %c0_i32 = arith.constant 0 : i32
    %c0_i32_0 = arith.constant 0 : i32
    return %arg0, %arg1, %c0_i32 : i32, i32, i32
  }
}

</mosaic_0001>

<bundles_post_ra>
// kernel: tpu_custom_call.1
= control target key start
LH: loop header
LB: loop body
LE: loop exit
PB: predicated region body
PF: predicated region fallthrough
CT: control target
= control target key end

     0   :  { %s1333_s0 = inlined_call_operand.hbm [shape: s32[32], index: 0, kind: input, shape index: {}]   ;;  %s1334_s1 = inlined_call_operand.vmem [shape: s32[2,16,1], index: 1, kind: input, shape index: {}]   ;;  %s1335_s2 = inlined_call_operand.hbm [shape: f32[7328,128], index: 2, kind: input, shape index: {}]   ;;  %s1336_s3 = inlined_call_operand.hbm [shape: f32[16,128], index: 3, kind: input, shape index: {}]   ;;  %s1337_s4 = inlined_call_operand.hbm [shape: f32[3,128], index: 4, kind: input, shape index: {}]   ;;  %s1338_s5 = inlined_call_operand.hbm [shape: f32[2,16,128], index: 5, kind: output, shape index: {}]  }
   0x1   :  { %1348 = sst [smem:[#allocation27_spill]] %s1334_s1  ;;  %s771_s20 = scalar_lea.hbm %s1333_s0, 16 }
   0x2   :  { %1349 = sst [smem:[#allocation28_spill]] %s1336_s3  ;;  %p772_p0 = scmp.ne.s32.totalorder %s1333_s0, %s771_s20 }
   0x3   :  { %1350 = sst [smem:[#allocation29_spill]] %s1337_s4  ;;  %p775_p1 = scmp.lt.u32.totalorder %s771_s20, %s1333_s0 }
   0x5   :  { %p777_p2 = pnand %p775_p1, %p772_p0 }
   0x7   :  { %780 = shalt.err (!%p777_p2)  }
   0x8   :  { %s997_s25 = smov [#allocation5]  }
   0x9   :  { %11 = dma.hbm_to_smem %s1333_s0, 16, %s997_s25, [#allocation4] }
   0xa   :  { %949 = dma.done.wait [#allocation4], 16 }
   0xb   :  { %950 = vsyncadd [#allocation4], 4294967280 }
   0xc   :  { %13 = sfence }
   0xd   :  { %14 = vsyncpa [#allocation7], 0 }
   0xe   :  { %15 = vsyncpa [#allocation10], 0 }
   0xf   :  { %16 = vsyncpa [#allocation8], 0 }
  0x10   :  { %18 = vsyncpa [#allocation8 + $0x1], 0  ;;  %s1050_s28 = smov 0   ;;  %s1052_s29 = smov 0  }
  0x11   :  { %s1054_s30 = smov 0   ;;  %s1056_s6 = smov 0  }
  0x12   :  { %s1058_s7 = smov 0   ;;  %s1060_s8 = smov 0  }
  0x13 LB: > { %1351 = sst [smem:[#allocation24_spill]] %s983_s7  ;;  %s610_s0 = sadd.s32 4294967295, %s987_s8   ;;  %s987_s8 = sphi %s1060_s8, %s24_s8   ;;  %s983_s7 = sphi %s1058_s7, %s1373_s7   ;;  %s979_s6 = sphi %s1056_s6, %s1372_s6   ;;  %s975_s30 = sphi %s1054_s30, %s1376_s30   ;;  %s971_s29 = sphi %s1052_s29, %s1375_s29   ;;  %s967_s28 = sphi %s1050_s28, %s1374_s28  }
  0x14   : > { %s611_s9 = sadd.s32 4294967294, %s987_s8   ;;  %s36_s10 = sadd.s32 1, %s983_s7 }
  0x15   : > { %s120_s11 = sadd.s32 1, %s975_s30  ;;  %p38_p3 = scmp.ge.s32.totalorder %s36_s10, 2 }
  0x16   : > { %p130_p4 = scmp.ne.s32.totalorder %s975_s30, %s971_s29  ;;  %p131_p5 = scmp.eq.s32.totalorder %s610_s0, 1 }
  0x17   : > { %p136_p6 = scmp.ne.s32.totalorder %s971_s29, %s967_s28  ;;  %s1378_s10 = smov (%p38_p3, %s36_s10), 0 }
  0x18   : > { %1352 = sst [smem:[#allocation25_spill]] %s1378_s10  ;;  %p1090_p7 = por %p131_p5, %p130_p4 }
  0x19   : > { %p137_p8 = scmp.eq.s32.totalorder %s611_s9, 1  ;;  %s115_s13 = ssub.s32 %s983_s7, %s1378_s10 }
  0x1a   : > { %s1353_s12 = scalar_select %p1090_p7, 1, 0 }
  0x1b   : > { %p612_p9 = scmp.ge.s32.totalorder %s987_s8, 1  ;;  %p118_p10 = scmp.eq.s32.totalorder %s115_s13, 0 }
  0x1c   : > { %p1097_p11 = por %p137_p8, %p136_p6  ;;  %p144_p12 = scmp.lt.s32.totalorder %s987_s8, 3 }
  0x1d   : > { %s1103_s15 = scalar_select %p118_p10, %s975_s30, %s120_s11  }
  0x1e   : > { %s1354_s14 = scalar_select %p1097_p11, 1, 0 }
  0x1f   : > { %1355 = sst [smem:[#allocation26_spill]] %s1103_s15  ;;  %p1105_p13 = pnand %p612_p9, %p144_p12 }
  0x20   : > { %p1109_p0 = scmp.eq.s32.totalorder %s610_s0, 0  ;;  %s998_s18 = smov [#allocation6]  }
  0x21   : > { %s1356_s16 = scalar_select %p1105_p13, 1, 0 }
  0x22   : > { %s1357_s17 = scalar_select %p1109_p0, 1, 0 }
  0x23   : > { %p664_p1 = pneg %p1105_p13  ;;  %s159_s19 = sshll.u32 %s998_s18, 4  ;;  %s160_s19 = int_to_ptr.vmem [resolvable:$true] %s159_s19 }
  0x24   : > { %s999_s21 = smov [#allocation9]   ;;  %s1359_s3 = sld [smem:[#allocation28_spill]] }
  0x25   : > { %p1117_p2 = pnand %p1109_p0, %p664_p1  ;;  %s173_s22 = sshll.u32 %s999_s21, 4  ;;  %s1121_s22 = int_to_ptr.vmem [resolvable:$true] %s173_s22 }
  0x27   : > { %p783_p4 = pneg %p1117_p2 }
  0x2a   : > { %s781_s25 = scalar_lea.hbm %s1359_s3, 256 }
  0x2b   : > { %p782_p3 = scmp.ne.s32.totalorder %s1359_s3, %s781_s25  ;;  %p788_p8 = scmp.lt.u32.totalorder %s781_s25, %s1359_s3 }
  0x2d   : > { %p784_p5 = pnand %p783_p4, %p782_p3 }
  0x2f   : > { %p785_p6 = pneg %p784_p5 }
  0x31   : > { %p790_p9 = pnand %p788_p8, %p785_p6 }
  0x33   : > { %793 = shalt.err (!%p790_p9)
}
  0x34   : > { %s794_s11 = scalar_lea.vmem %s160_s19, 256  ;;  %p802_p11 = scmp.lt.s32.totalorder %s160_s19, %s160_s19 }
  0x35   : > { %p795_p10 = scmp.ne.s32.totalorder %s160_s19, %s794_s11  ;;  %p803_p7 = scmp.lt.s32.totalorder %s794_s11, %s794_s11 }
  0x37   : > { %p797_p12 = pnand %p795_p10, %p783_p4  ;;  %p804_p0 = por %p803_p7, %p802_p11 }
  0x39   : > { %p798_p1 = pneg %p797_p12 }
  0x3b   : > { %p805_p13 = pnand %p804_p0, %p798_p1 }
  0x3d   : > { %808 = shalt.err (!%p805_p13)
}
  0x3e   : > { %s1000_s13 = smov 128   ;;  %s1001_s18 = smov 8  }
  0x3f   : > { %667 = dma.hbm_to_vmem [thread:$0]  (!%p1117_p2), %s1359_s3, 256, %s160_s19, [#allocation7], %s1000_s13, %s1000_s13, %s1001_s18  }
  0x40   : > { %s1360_s4 = sld [smem:[#allocation29_spill]] }
  0x46   : > { %s809_s26 = scalar_lea.hbm %s1360_s4, 64 }
  0x47   : > { %p810_p3 = scmp.ne.s32.totalorder %s1360_s4, %s809_s26  ;;  %p816_p13 = scmp.lt.u32.totalorder %s809_s26, %s1360_s4 }
  0x49   : > { %p812_p7 = pnand %p810_p3, %p783_p4 }
  0x4b   : > { %p813_p11 = pneg %p812_p7 }
  0x4d   : > { %p818_p0 = pnand %p816_p13, %p813_p11 }
  0x4f   : > { %821 = shalt.err (!%p818_p0)
}
  0x50   : > { %s822_s19 = scalar_lea.vmem %s1121_s22, 64  ;;  %p830_p9 = scmp.lt.s32.totalorder %s1121_s22, %s1121_s22 }
  0x51   : > { %p823_p5 = scmp.ne.s32.totalorder %s1121_s22, %s822_s19  ;;  %p831_p10 = scmp.lt.s32.totalorder %s822_s19, %s822_s19 }
  0x53   : > { %p825_p6 = pnand %p823_p5, %p783_p4  ;;  %p832_p12 = por %p831_p10, %p830_p9 }
  0x55   : > { %p826_p8 = pneg %p825_p6 }
  0x57   : > { %p833_p1 = pnand %p832_p12, %p826_p8 }
  0x59   : > { %836 = shalt.err (!%p833_p1)
}
  0x5a   : > { %670 = dma.hbm_to_vmem [thread:$0]  (!%p1117_p2), %s1360_s4, 64, %s1121_s22, [#allocation10]  }
  0x5b   : > { %p1361_p3 = scmp.ne.s32.totalorder %s1356_s16, 0 }
  0x5c   : > { %p1362_p7 = scmp.ne.s32.totalorder (!%p1361_p3), %s1357_s17, 0 }
  0x5d   : > { %199 = sbr.rel (%p1361_p3) target bundleno = 360 (0x168), region = 32 }
  0x64   : > { %952 = dma.done.wait (%p1362_p7), [#allocation7], 256  }
  0x65   : > { %954 = vsyncadd (%p1362_p7), [#allocation7], 4294967040 }
  0x66   : > { %956 = dma.done.wait (%p1362_p7), [#allocation10], 64  }
  0x67   : > { %958 = vsyncadd (%p1362_p7), [#allocation10], 4294967232  ;;  %s1343_s20 = sand.u32 1, %s971_s29   ;;  %p232_p2 = scmp.lt.s32.totalorder %s979_s6, 1 }
  0x68   : > { %s619_s16 = sshll.u32 %s1343_s20, 4  ;;  %s1363_s1 = sld [smem:[#allocation27_spill]] }
  0x69   : > { %s233_s21 = scalar_select %p232_p2, %s979_s6, 1 }
  0x6a   : > { %s1191_s27 = scalar_lea.vmem [#allocation11], %s619_s16  ;;  %s1193_s17 = smov 0  }
  0x6b   : > { %s648_s23 = sshll.u32 %s233_s21, 4 }
  0x6e   : > { %s1189_s26 = scalar_lea.vmem %s1363_s1, %s648_s23 }
  0x6f LB: >> { %s1364_s22 = sshll.u32 %s979_s6, 4  ;;  %p254_p4 = scmp.lt.s32.totalorder %s991_s17, 0  ;;  %s991_s17 = sphi %s1193_s17, %s251_s17  }
  0x70   : >> { %s252_s0 = sadd.s32 %s991_s17, %s1364_s22  ;;  %s255_s11 = ssub.s32 0, %s991_s17 }
  0x71   : >> { %s253_s9 = sld [smem:[#allocation5 + %s252_s0]]  ;;  %s623_s19 = smin.u32 %s991_s17, %s255_s11 }
  0x72   : >> { %s257_s13 = sand.u32 7, %s623_s19   ;;  %s268_s16 = scalar_lea.vmem [#allocation2], %s991_s17 }
  0x73   : >> { %s258_s18 = ssub.s32 0, %s257_s13  ;;  %s277_s21 = sshll.u32 %s268_s16, 4  ;;  %s278_s21 = int_to_ptr.vmem [resolvable:$true] %s277_s21 }
  0x74   : >> { %s1380_s18 = smov (!%p254_p4, %s258_s18), %s257_s13  ;;  %s1346_s11 = scalar_lea.hbm %s1335_s2, 117248 }
  0x75   : >> { %p625_p11 = scmp.lt.s32.totalorder %s1380_s18, 0  ;;  %s264_s23 = sadd.s32 8, %s1380_s18 }
  0x77   : >> { %s626_s24 = sshll.u32 %s253_s9, 4  ;;  %s1382_s23 = smov (!%p625_p11, %s264_s23), %s1380_s18 }
  0x78   : >> { %s267_s1 = scalar_lea.hbm %s1335_s2, %s626_s24  ;;  %s269_s3 = scalar_lea.sflag [#allocation3], %s1382_s23 }
  0x79   : >> { %s837_s22 = scalar_lea.hbm %s267_s1, 16  ;;  %p840_p0 = scmp.lt.u32.totalorder %s267_s1, %s1335_s2 }
  0x7a   : >> { %p838_p13 = scmp.ne.s32.totalorder %s267_s1, %s837_s22  ;;  %p841_p5 = scmp.lt.u32.totalorder %s1346_s11, %s837_s22 }
  0x7b   : >> { %p843_p8 = scmp.lt.u32.totalorder %s837_s22, %s267_s1 }
  0x7c   : >> { %p842_p6 = por %p841_p5, %p840_p0 }
  0x7e   : >> { %p844_p9 = por %p843_p8, %p842_p6 }
  0x80   : >> { %p845_p10 = pnand %p844_p9, %p838_p13 }
  0x82   : >> { %848 = shalt.err (!%p845_p10)  }
  0x83   : >> { %s849_s20 = scalar_lea.vmem %s278_s21, 16  ;;  %s1002_s9 = smov [#allocation2]  }
  0x84   : >> { %p850_p12 = scmp.ne.s32.totalorder %s278_s21, %s849_s20  ;;  %s851_s18 = sshll.u32 %s1002_s9, 4  ;;  %s1218_s18 = int_to_ptr.vmem [resolvable:$false] %s851_s18 }
  0x85   : >> { %s1345_s4 = scalar_lea.vmem %s1218_s18, 256  ;;  %p854_p1 = scmp.lt.s32.totalorder %s278_s21, %s1218_s18 }
  0x86   : >> { %p855_p3 = scmp.lt.s32.totalorder %s1345_s4, %s849_s20 }
  0x88   : >> { %p856_p7 = por %p855_p3, %p854_p1 }
  0x8a   : >> { %p857_p2 = pnand %p856_p7, %p850_p12 }
  0x8c   : >> { %860 = shalt.err (!%p857_p2)  }
  0x8d   : >> { %280 = dma.hbm_to_vmem [thread:$0]  %s267_s1, 16, %s278_s21, %s269_s3 }
  0x8e   : >> { %s251_s17 = sadd.s32 1, %s991_s17  }
  0x8f   : >> { %p248_p4 = scmp.ge.s32.totalorder %s251_s17, 8  }
  0x90   : > { %s1227_s10 = smov (%p248_p4), 0  }
  0x91   : > { %250 = sbr.rel (!%p248_p4) target bundleno = 111 (0x6f), region = 117 }
  0x98 LB: >> { %p287_p11 = scmp.lt.s32.totalorder %s995_s10, 0  ;;  %s288_s22 = ssub.s32 0, %s995_s10  ;;  %s995_s10 = sphi %s1227_s10, %s286_s10  }
  0x99   : >> { %s627_s23 = smin.u32 %s995_s10, %s288_s22 }
  0x9a   : >> { %s290_s1 = sand.u32 7, %s627_s23  }
  0x9b   : >> { %s291_s3 = ssub.s32 0, %s290_s1 }
  0x9c   : >> { %s1384_s3 = smov (!%p287_p11, %s291_s3), %s290_s1 }
  0x9d   : >> { %p629_p13 = scmp.lt.s32.totalorder %s1384_s3, 0  ;;  %s297_s21 = sadd.s32 8, %s1384_s3 }
  0x9f   : >> { %s1386_s21 = smov (!%p629_p13, %s297_s21), %s1384_s3 }
  0xa0   : >> { %s299_s17 = scalar_lea.sflag [#allocation3], %s1386_s21 }
  0xa1   : >> { %959 = dma.done.wait %s299_s17, 16 }
  0xa2   : >> { %960 = vsyncadd %s299_s17, 4294967280  ;;  %s1236_s24 = sadd.s32 8, %s995_s10  ;;  %s1365_s25 = sshll.u32 %s979_s6, 4 }
  0xa3   : >> { %p679_p0 = scmp.lt.s32.totalorder %s1236_s24, 16  ;;  %s308_s0 = sadd.s32 %s1365_s25, %s1236_s24 }
  0xa4   : >> { %p310_p5 = scmp.lt.s32.totalorder %s1236_s24, 0  ;;  %s311_s13 = ssub.s32 0, %s1236_s24 }
  0xa5   : >> { %s659_s19 = scalar_select %p679_p0, [#allocation5], [#allocation18] }
  0xa6   : >> { %s1388_s0 = smov (!%p679_p0, %s308_s0), 0  ;;  %s631_s20 = smin.u32 %s311_s13, %s1236_s24 }
  0xa7   : >> { %s309_s16 = sld [smem:[%s659_s19 + %s1388_s0]]  ;;  %s313_s9 = sand.u32 7, %s631_s20  }
  0xa8   : >> { %s539_s22 = scalar_lea.vmem [#allocation2], %s995_s10  ;;  %s314_s1 = ssub.s32 0, %s313_s9 }
  0xa9   : >> { %s540_s23 = scalar_lea.vmem %s539_s22, 8 [#allocation2]  ;;  %s1390_s1 = smov (!%p310_p5, %s314_s1), %s313_s9 }
  0xaa   : >> { %s333_s3 = sshll.u32 %s540_s23, 4  ;;  %p633_p6 = scmp.lt.s32.totalorder %s1390_s1, 0  ;;  %s334_s3 = int_to_ptr.vmem [resolvable:$true] %s333_s3 }
  0xab   : >> { %s320_s21 = sadd.s32 8, %s1390_s1 }
  0xac   : >> { %s1392_s21 = smov (!%p633_p6, %s320_s21), %s1390_s1 }
  0xad   : >> { %s634_s17 = sshll.u32 %s309_s16, 4  ;;  %s325_s7 = scalar_lea.sflag [#allocation3], %s1392_s21 }
  0xae   : >> { %s323_s11 = scalar_lea.hbm %s1335_s2, %s634_s17  ;;  %s1366_s16 = scalar_lea.hbm %s1335_s2, 117248 }
  0xaf   : >> { %s861_s15 = scalar_lea.hbm %s323_s11, 16  ;;  %p866_p12 = scmp.lt.u32.totalorder %s323_s11, %s1335_s2 }
  0xb0   : >> { %p862_p8 = scmp.ne.s32.totalorder %s323_s11, %s861_s15  ;;  %p867_p1 = scmp.lt.u32.totalorder %s1366_s16, %s861_s15 }
  0xb1   : >> { %p869_p7 = scmp.lt.u32.totalorder %s861_s15, %s323_s11 }
  0xb2   : >> { %p863_p9 = pnand %p862_p8, %p679_p0  ;;  %p868_p3 = por %p867_p1, %p866_p12 }
  0xb4   : >> { %p864_p10 = pneg %p863_p9  ;;  %p870_p2 = por %p869_p7, %p868_p3 }
  0xb6   : >> { %p871_p4 = pnand %p870_p2, %p864_p10 }
  0xb8   : >> { %874 = shalt.err (!%p871_p4)  }
  0xb9   : >> { %s875_s4 = scalar_lea.vmem %s334_s3, 16  ;;  %p882_p6 = scmp.lt.s32.totalorder %s334_s3, %s1218_s18 }
  0xba   : >> { %p876_p11 = scmp.ne.s32.totalorder %s334_s3, %s875_s4  ;;  %s1367_s9 = scalar_lea.vmem %s1218_s18, 256 }
  0xbb   : >> { %p883_p8 = scmp.lt.s32.totalorder %s1367_s9, %s875_s4 }
  0xbc   : >> { %p877_p13 = pnand %p876_p11, %p679_p0 }
  0xbd   : >> { %p884_p9 = por %p883_p8, %p882_p6 }
  0xbe   : >> { %p878_p5 = pneg %p877_p13 }
  0xc0   : >> { %p885_p1 = pnand %p884_p9, %p878_p5 }
  0xc2   : >> { %888 = shalt.err (!%p885_p1)  }
  0xc3   : >> { %661 = dma.hbm_to_vmem [thread:$0]  (%p679_p0), %s323_s11, 16, %s334_s3, %s325_s7 }
  0xc4   : >> { %s286_s10 = sadd.s32 1, %s995_s10  }
  0xc5   : >> { %p283_p10 = scmp.ge.s32.totalorder %s286_s10, 16  }
  0xc6   : > { %v341_v0 = vld [vmem:[%s1189_s26] sm:$0xff] (%p283_p10)  ;;  %v342_v1 = vld [vmem:[%s1189_s26 + $0x8] sm:$0xff] (%p283_p10)  ;;  %v1003_v2 = vmov (%p283_p10), 0   ;;  %v1004_v3 = vmov (%p283_p10), 0.0   ;;  %v358_v13 = vlaneseq (%p283_p10)  ;;  %v339_v35 = vld [vmem:[#allocation6] sm:$0xff] (%p283_p10)  ;;  %s649_s7 = sshll.u32 (%p283_p10), %s979_s6, 8 }
  0xc7   : > { %285 = sbr.rel (!%p283_p10) target bundleno = 152 (0x98), region = 128  ;;  %754 = vset.pattern.permute.xlu0 (%p283_p10), %v1003_v2  ;;  %vm344_vm0 = vcmp.eq.s32.totalorder (%p283_p10), %v341_v0, 0  ;;  %vm345_vm1 = vcmp.eq.s32.totalorder (%p283_p10), %v342_v1, 0  ;;  %vm366_vm2 = vcmp.eq.s32.totalorder (%p283_p10), %v341_v0, 1  ;;  %vm367_vm3 = vcmp.eq.s32.totalorder (%p283_p10), %v342_v1, 1  ;;  %765 = vset.pattern.permute.xlu1 (%p283_p10), %v1003_v2  ;;  %v337_v31 = vld [vmem:[#allocation2] sm:$0xff] (%p283_p10)  ;;  %s1279_s18 = scalar_lea.hbm (%p283_p10), %s1338_s5, %s649_s7 }
  0xc8   : > { %v346_v4 = vsel (%p283_p10), %vm344_vm0, 1.0, %v1004_v3  ;;  %v347_v5 = vsel (%p283_p10), %vm345_vm1, 1.0, %v1004_v3  ;;  %v368_v6 = vsel (%p283_p10), %vm366_vm2, 1.0, %v1004_v3  ;;  %v369_v7 = vsel (%p283_p10), %vm367_vm3, 1.0, %v1004_v3  ;;  %v343_v16 = vld [vmem:[#allocation9] sm:$0x7] (%p283_p10) }
  0xc9   : > { %v755_v8 = vpack.i.bf16 (%p283_p10), %v347_v5, %v346_v4  ;;  %vm388_vm4 = vcmp.eq.s32.totalorder (%p283_p10), %v341_v0, 2  ;;  %vm389_vm5 = vcmp.eq.s32.totalorder (%p283_p10), %v342_v1, 2  ;;  %v760_v11 = vpack.i.bf16 (%p283_p10), %v369_v7, %v368_v6  ;;  %v338_v34 = vld [vmem:[#allocation2 + $0x8] sm:$0xff] (%p283_p10)  ;;  %v340_v36 = vld [vmem:[#allocation6 + $0x8] sm:$0xff] (%p283_p10)  ;;  %s432_s15 = sshll.u32 (%p283_p10), %s1191_s27, 4  ;;  %s1368_s10 = sand.u32 (%p283_p10), 1, %s971_s29   ;;  %s1281_s15 = int_to_ptr.vmem [resolvable:$true] %s432_s15 }
  0xca   : > { %v390_v9 = vsel (%p283_p10), %vm388_vm4, 1.0, %v1004_v3  ;;  %v391_v10 = vsel (%p283_p10), %vm389_vm5, 1.0, %v1004_v3  ;;  %v359_v14 = vshrl.u32 (%p283_p10), %v358_v13, 7  ;;  %v410_v43 = vadd.f32 (%p283_p10), %v339_v35, %v337_v31  ;;  %s1287_s24 = scalar_lea.sflag (%p283_p10), [#allocation8], %s1368_s10  ;;  %s889_s6 = scalar_lea.vmem (%p283_p10), %s1281_s15, 256 }
  0xcb   : > { %756 = vperm.xlu0 (%p283_p10), %754, %v755_v8   ;;  %v766_v12 = vpack.i.bf16 (%p283_p10), %v391_v10, %v390_v9  ;;  %v411_v44 = vadd.f32 (%p283_p10), %v340_v36, %v338_v34  ;;  %p890_p0 = scmp.ne.s32.totalorder (%p283_p10), %s1281_s15, %s889_s6  ;;  %p1369_p12 = scmp.ne.s32.totalorder (%p283_p10), %s1353_s12, 0 }
  0xcc   : > { %v360_v15 = vsub.s32 (%p283_p10), 0, %v359_v14  ;;  %v382_v17 = vsub.s32 (%p283_p10), 1, %v359_v14  ;;  %v404_v18 = vsub.s32 (%p283_p10), 2, %v359_v14  ;;  %s1005_s22 = smov (%p283_p10), [#allocation11]  }
  0xcd   : > { %767 = vperm.xlu1 (%p283_p10), %765, %v766_v12   ;;  %p891_p3 = pnand (%p283_p10), %p890_p0, %p1369_p12  ;;  %s893_s23 = sshll.u32 (%p283_p10), %s1005_s22, 4  ;;  %s894_s23 = int_to_ptr.vmem [resolvable:$false] %s893_s23 }
  0xce   : > { %v361_v20 = vrot.slane %v343_v16, %v360_v15  ;;  %v383_v24 = vrot.slane %v343_v16, %v382_v17  ;;  %v405_v25 = vrot.slane %v343_v16, %v404_v18  ;;  %s895_s1 = scalar_lea.vmem %s894_s23, 512  ;;  %p896_p2 = scmp.lt.s32.totalorder %s1281_s15, %s894_s23 }
  0xcf   : > { %761 = vperm.xlu0 %754, %v760_v11   ;;  %p892_p7 = pneg %p891_p3  ;;  %p897_p4 = scmp.lt.s32.totalorder %s895_s1, %s889_s6 }
  0xd1   : > { %p898_p11 = por %p897_p4, %p896_p2 }
  0xd3   : > { %p899_p13 = pnand %p898_p11, %p892_p7 }
 0x14a   : > { %v757_v19 = vpop.permute.xlu0 %756 }
 0x14b   : > { %v759_v21 = vunpack.i.h.bf16 %v757_v19  ;;  %v758_v22 = vunpack.i.l.bf16 %v757_v19 }
 0x14c   : > { %v768_v23 = vpop.permute.xlu1 %767 }
 0x14d   : > { %v770_v26 = vunpack.i.h.bf16 %v768_v23  ;;  %v769_v27 = vunpack.i.l.bf16 %v768_v23  ;;  %v363_v32 = vmul.f32 %v759_v21, %v361_v20  ;;  %v362_v33 = vmul.f32 %v758_v22, %v361_v20 }
 0x14e   : > { %v762_v28 = vpop.permute.xlu0 %761 }
 0x14f   : > { %v764_v29 = vunpack.i.h.bf16 %v762_v28  ;;  %v763_v30 = vunpack.i.l.bf16 %v762_v28  ;;  %v407_v39 = vmul.f32 %v770_v26, %v405_v25  ;;  %v406_v40 = vmul.f32 %v769_v27, %v405_v25 }
 0x151   : > { %v385_v37 = vmul.f32 %v764_v29, %v383_v24  ;;  %v384_v38 = vmul.f32 %v763_v30, %v383_v24 }
 0x153   : > { %v386_v41 = vadd.f32 %v384_v38, %v362_v33  ;;  %v387_v42 = vadd.f32 %v385_v37, %v363_v32 }
 0x155   : > { %v408_v45 = vadd.f32 %v406_v40, %v386_v41  ;;  %v409_v46 = vadd.f32 %v407_v39, %v387_v42 }
 0x157   : > { %v412_v47 = vadd.f32 %v410_v43, %v408_v45  ;;  %v413_v48 = vadd.f32 %v411_v44, %v409_v46 }
 0x159   : > { %414 = vst [vmem:[%s1191_s27] sm:$0xff] %v412_v47  ;;  %415 = vst [vmem:[%s1191_s27 + $0x8] sm:$0xff] %v413_v48 }
 0x15a   : > { %902 = shalt.err (!%p899_p13)
}
 0x15b   : > { %s903_s27 = scalar_lea.hbm %s1279_s18, 256  ;;  %s907_s17 = scalar_lea.hbm %s1338_s5, 512 }
 0x15c   : > { %p904_p5 = scmp.ne.s32.totalorder %s1279_s18, %s903_s27  ;;  %p908_p9 = scmp.lt.u32.totalorder %s1279_s18, %s1338_s5 }
 0x15d   : > { %p909_p1 = scmp.lt.u32.totalorder %s907_s17, %s903_s27  ;;  %p911_p0 = scmp.lt.u32.totalorder %s903_s27, %s1279_s18 }
 0x15e   : > { %p905_p6 = pnand %p904_p5, %p1369_p12 }
 0x15f   : > { %p910_p10 = por %p909_p1, %p908_p9 }
 0x160   : > { %p906_p8 = pneg %p905_p6 }
 0x161   : > { %p912_p3 = por %p911_p0, %p910_p10 }
 0x163   : > { %p913_p7 = pnand %p912_p3, %p906_p8 }
 0x165   : > { %916 = shalt.err (!%p913_p7)
}
 0x166   : > { %s1006_s19 = smov 128   ;;  %s1007_s13 = smov 8  }
 0x167   : > { %662 = dma.vmem_to_hbm [thread:$0]  (%p1369_p12), %s1281_s15, 256, %s1279_s18, %s1287_s24, %s1006_s19, %s1006_s19, %s1007_s13  }
 0x168 PF: > { %p680_p2 = scmp.ge.s32.totalorder %s987_s8, 2  ;;  %s447_s20 = sand.u32 1, %s967_s28  }
 0x169   : > { %p1370_p4 = scmp.ne.s32.totalorder %s1354_s14, 0  ;;  %s448_s16 = scalar_lea.sflag [#allocation8], %s447_s20 }
 0x16b   : > { %p672_p11 = pnand %p680_p2, %p1370_p4 }
 0x16d   : > { %962 = dma.done.wait (!%p672_p11), %s448_s16, 256  }
 0x16e   : > { %964 = vsyncadd (!%p672_p11), %s448_s16, 4294967040  ;;  %s24_s8 = sadd.s32 1, %s987_s8   ;;  %s1371_s4 = sld [smem:[#allocation26_spill]] }
 0x16f   : > { %p21_p13 = scmp.ge.s32.totalorder %s24_s8, 4   ;;  %s1372_s6 = sld [smem:[#allocation24_spill]] }
 0x170   : > { %s1373_s7 = sld [smem:[#allocation25_spill]]  ;;  %s1374_s28 = smov %s971_s29 }
 0x171   : > { %s1375_s29 = smov %s975_s30  ;;  %23 = sbr.rel (!%p21_p13) target bundleno = 19 (0x13), region = 139 }
 0x174   : > { %s1376_s30 = smov %s1371_s4 }
 0x178   :  { %453 = vsyncpa [#allocation7], 1 }
 0x179   :  { %455 = vsyncpa [#allocation7 + $0x1], 1 }
 0x17a   :  { %456 = vsyncpa [#allocation10], 1 }
 0x17b   :  { %457 = vsyncpa [#allocation8], 1 }
 0x17c   :  { %459 = vsyncpa [#allocation8 + $0x1], 1 }
 0x17d   :  { %460 = vsyncmov [#allocation3] }
 0x180   :  { %s461_s12 = vpop.sfrf %460 }
 0x181   :  { %p640_p12 = scmp.ne.s32.totalorder %s461_s12, 0 }
 0x183   :  { %465 = shalt.err (%p640_p12)  }
 0x184   :  { %467 = vsyncmov [#allocation3 + $0x1] }
 0x187   :  { %s468_s14 = vpop.sfrf %467 }
 0x188   :  { %p641_p5 = scmp.ne.s32.totalorder %s468_s14, 0 }
 0x18a   :  { %472 = shalt.err (%p641_p5)  }
 0x18b   :  { %474 = vsyncmov [#allocation3 + $0x2] }
 0x18e   :  { %s475_s9 = vpop.sfrf %474 }
 0x18f   :  { %p642_p6 = scmp.ne.s32.totalorder %s475_s9, 0 }
 0x191   :  { %479 = shalt.err (%p642_p6)  }
 0x192   :  { %481 = vsyncmov [#allocation3 + $0x3] }
 0x195   :  { %s482_s8 = vpop.sfrf %481 }
 0x196   :  { %p643_p8 = scmp.ne.s32.totalorder %s482_s8, 0 }
 0x198   :  { %486 = shalt.err (%p643_p8)  }
 0x199   :  { %488 = vsyncmov [#allocation3 + $0x4] }
 0x19c   :  { %s489_s2 = vpop.sfrf %488 }
 0x19d   :  { %p644_p9 = scmp.ne.s32.totalorder %s489_s2, 0 }
 0x19f   :  { %493 = shalt.err (%p644_p9)  }
 0x1a0   :  { %495 = vsyncmov [#allocation3 + $0x5] }
 0x1a3   :  { %s496_s5 = vpop.sfrf %495 }
 0x1a4   :  { %p645_p1 = scmp.ne.s32.totalorder %s496_s5, 0 }
 0x1a6   :  { %500 = shalt.err (%p645_p1)  }
 0x1a7   :  { %502 = vsyncmov [#allocation3 + $0x6] }
 0x1aa   :  { %s503_s28 = vpop.sfrf %502 }
 0x1ab   :  { %p646_p10 = scmp.ne.s32.totalorder %s503_s28, 0 }
 0x1ad   :  { %507 = shalt.err (%p646_p10)  }
 0x1ae   :  { %509 = vsyncmov [#allocation3 + $0x7] }
 0x1b1   :  { %s510_s29 = vpop.sfrf %509 }
 0x1b2   :  { %p647_p0 = scmp.ne.s32.totalorder %s510_s29, 0 }
 0x1b4   :  { %514 = shalt.err (%p647_p0)  }

</bundles_post_ra>
